<compile_context>
chip_gen: v5e
topology: v5e:2x2
jax: 0.10.0
libtpu: 0.0.40
codegen_flags: <defaults>
</compile_context>

<pallas_src>
import functools

import jax
import jax.numpy as jnp
from jax.experimental import pallas as pl
from jax.experimental.pallas import tpu as pltpu


def _round_up(n: int, m: int) -> int:
    return ((n + m - 1) // m) * m


def _fused_mlp_kernel(*refs, num_layers: int):
    """Single fused kernel: unrolled [h @ W + b (+ReLU)] chain, all in VMEM.

    refs = (x_ref, w0, b0, w1, b1, ..., w_{L-1}, b_{L-1}, o_ref)
    x is f32 (cast to bf16 here), W is bf16, b is f32 ((rows,Dop) or (1,Dop)),
    output is f32. Accumulation is f32 on the MXU; the bias + ReLU epilogue
    stays in f32 and activations are cast to bf16 only to feed the next matmul.
    """
    x_ref = refs[0]
    o_ref = refs[-1]
    wb = refs[1:-1]

    h = x_ref[...].astype(jnp.bfloat16)           # (rows, Din)
    for i in range(num_layers):
        w = wb[2 * i][...]                        # (Dip, Dop) bf16
        b = wb[2 * i + 1][...]                    # (rows, Dop) or (1, Dop) f32
        acc = jnp.dot(h, w, preferred_element_type=jnp.float32)
        acc = acc + b                             # f32 epilogue
        if i < num_layers - 1:
            acc = jnp.maximum(acc, 0.0)
            # TODO(synk): training-mode dropout (Bernoulli mask + 1/(1-p) scale
            # via pltpu.prng_random_bits) omitted — eval-mode forward is identity.
            h = acc.astype(jnp.bfloat16)
        else:
            o_ref[...] = acc.astype(o_ref.dtype)


def fused_mlp_pallas(x, weights, biases, pdims, *, grid_rows=None):
    """x: (B, Din) f32 (raw, unpadded). weights[i]: (pdims[i], pdims[i+1]) bf16.
    biases[i]: (rows, pdims[i+1]) or (1, pdims[i+1]) f32.
    grid_rows=None -> single full-extent block; else a 1-D "parallel" batch grid.
    """
    B, Din = x.shape
    L = len(weights)
    out_dim = pdims[-1]
    assert Din == pdims[0]

    kernel = functools.partial(_fused_mlp_kernel, num_layers=L)

    flops = 2 * B * sum(pdims[i] * pdims[i + 1] for i in range(L))
    bytes_accessed = (x.size * x.dtype.itemsize + B * out_dim * 4
                      + sum(w.size * w.dtype.itemsize for w in weights)
                      + sum(b.size * b.dtype.itemsize for b in biases))
    cost = pl.CostEstimate(flops=flops, transcendentals=0,
                           bytes_accessed=bytes_accessed)

    inputs = [x]
    for w, b in zip(weights, biases):
        inputs.append(w)
        inputs.append(b)

    if grid_rows is None:
        # Grid-less path: every operand is one full-extent VMEM-resident block.
        # Total footprint << default scoped VMEM, so no vmem_limit override.
        in_specs = [pl.BlockSpec((B, Din), lambda: (0, 0),
                                 memory_space=pltpu.MemorySpace.VMEM)]
        for li in range(L):
            in_specs.append(
                pl.BlockSpec((pdims[li], pdims[li + 1]), lambda: (0, 0),
                             memory_space=pltpu.MemorySpace.VMEM))
            in_specs.append(
                pl.BlockSpec(biases[li].shape, lambda: (0, 0),
                             memory_space=pltpu.MemorySpace.VMEM))
        out_specs = pl.BlockSpec((B, out_dim), lambda: (0, 0),
                                 memory_space=pltpu.MemorySpace.VMEM)
        return pl.pallas_call(
            kernel,
            out_shape=jax.ShapeDtypeStruct((B, out_dim), jnp.float32),
            in_specs=in_specs,
            out_specs=out_specs,
            cost_estimate=cost,
        )(*inputs)

    # Batch-gridded path (large B): x/out are row tiles pipelined over the
    # batch; grid axis is "parallel" so v7x megacore can split it. Weights and
    # biases map to block (0,0) every step -> DMA'd once, VMEM-resident.
    rows = grid_rows
    assert B % rows == 0
    in_specs = [pl.BlockSpec((rows, Din), lambda i: (i, 0))]
    for li in range(L):
        in_specs.append(
            pl.BlockSpec((pdims[li], pdims[li + 1]), lambda i: (0, 0)))
        in_specs.append(pl.BlockSpec(biases[li].shape, lambda i: (0, 0)))
    out_specs = pl.BlockSpec((rows, out_dim), lambda i: (i, 0))
    return pl.pallas_call(
        kernel,
        out_shape=jax.ShapeDtypeStruct((B, out_dim), jnp.float32),
        grid=(B // rows,),
        in_specs=in_specs,
        out_specs=out_specs,
        cost_estimate=cost,
        compiler_params=pltpu.CompilerParams(
            dimension_semantics=("parallel",)),
    )(*inputs)


class FullyConnectedPallas:
    """Mirrors FullyConnected(input_dim, hidden_dims, output_dim, dropout)."""

    def __init__(self, input_dim, hidden_dims, output_dim, dropout=0.3, key=None):
        if key is None:
            key = jax.random.PRNGKey(0)
        self.dropout = dropout  # eval-mode: identity
        dims = [input_dim] + list(hidden_dims) + [output_dim]
        self.dims = dims
        # Lane-dense (128-multiple) *hidden* dims only; input/output dims stay
        # exact so no wrapper-side pad/slice is needed around the kernel.
        self.pdims = ([input_dim]
                      + [_round_up(d, 128) for d in hidden_dims]
                      + [output_dim])

        # Exact f32 params (reference) with nn.Linear-default init
        # U(-1/sqrt(fan_in), 1/sqrt(fan_in)); stored as (in_dim, out_dim).
        self.params = []
        for i in range(len(dims) - 1):
            fan_in, fan_out = dims[i], dims[i + 1]
            key, kw, kb = jax.random.split(key, 3)
            bound = 1.0 / float(fan_in) ** 0.5
            w = jax.random.uniform(kw, (fan_in, fan_out), jnp.float32, -bound, bound)
            b = jax.random.uniform(kb, (1, fan_out), jnp.float32, -bound, bound)
            self.params.append((w, b))

        # Pre-pad once at init (zero padding keeps the math exact):
        #   W_i : (pdims[i], pdims[i+1]) bf16  (MXU operand)
        #   b_i : (1, pdims[i+1])        f32   (epilogue)
        self.weights = []
        self._biases_1row = []
        for i, (w, b) in enumerate(self.params):
            din, dout = w.shape
            wp = jnp.zeros((self.pdims[i], self.pdims[i + 1]), jnp.bfloat16)
            wp = wp.at[:din, :dout].set(w.astype(jnp.bfloat16))
            bp = jnp.zeros((1, self.pdims[i + 1]), jnp.float32)
            bp = bp.at[:, :dout].set(b)
            self.weights.append(wp)
            self._biases_1row.append(bp)
        self._bias_cache = {}

    def _biases_broadcast(self, rows):
        # Pre-broadcast biases to (rows, Dop) once per batch size: removes the
        # per-layer (1, Dop) sublane-broadcast from the kernel's epilogue.
        if rows not in self._bias_cache:
            self._bias_cache[rows] = [
                jnp.broadcast_to(bp, (rows, bp.shape[1]))
                for bp in self._biases_1row
            ]
        return self._bias_cache[rows]

    def __call__(self, x, block_rows=256):
        B = x.shape[0]
        if B > block_rows and B % block_rows == 0:
            # Large batch: row-tiled "parallel" grid; (1, Dop) biases (their
            # broadcast amortizes over the large tile).
            return fused_mlp_pallas(x, self.weights, self._biases_1row,
                                    self.pdims, grid_rows=block_rows)
        # Small batch: single full-extent block, biases pre-broadcast to B rows.
        return fused_mlp_pallas(x, self.weights, self._biases_broadcast(B),
                                self.pdims, grid_rows=None)


def _reference(x, params):
    n = len(params)
    for i, (w, b) in enumerate(params):
        x = x @ w + b
        if i < n - 1:
            x = jnp.maximum(x, 0.0)
    return x


if __name__ == "__main__":
    key = jax.random.PRNGKey(0)
    k_in, k_in2, k_model = jax.random.split(key, 3)

    batch, input_dim = 8, 32
    hidden_dims = [64, 48]
    output_dim = 16

    model = FullyConnectedPallas(input_dim, hidden_dims, output_dim,
                                 dropout=0.3, key=k_model)

    # 1) Small batch -> grid-less single-block path (no wrapper pad/slice ops).
    x = jax.random.normal(k_in, (batch, input_dim), jnp.float32)
    out = jax.block_until_ready(model(x))
    ref = _reference(x, model.params)
    assert out.shape == (batch, output_dim), out.shape
    # bf16 MXU operands with f32 accumulation: loosened tolerance vs f32 ref.
    assert jnp.allclose(out, ref, atol=5e-2, rtol=5e-2), "mismatch (grid-less)"

    # 2) Larger batch -> batch-gridded ("parallel") path.
    big_b = 512
    x2 = jax.random.normal(k_in2, (big_b, input_dim), jnp.float32)
    out2 = jax.block_until_ready(model(x2, block_rows=256))
    ref2 = _reference(x2, model.params)
    assert out2.shape == (big_b, output_dim), out2.shape
    assert jnp.allclose(out2, ref2, atol=5e-2, rtol=5e-2), "mismatch (gridded)"

    print("KERNEL_OK")
</pallas_src>

<mosaic_0001>
module attributes {stable_mosaic.version = 11 : i64} {
  func.func @_fused_mlp_kernel(%arg0: memref<8x32xf32, #tpu.memory_space<vmem>>, %arg1: memref<32x128xbf16, #tpu.memory_space<vmem>>, %arg2: memref<8x128xf32, #tpu.memory_space<vmem>>, %arg3: memref<128x128xbf16, #tpu.memory_space<vmem>>, %arg4: memref<8x128xf32, #tpu.memory_space<vmem>>, %arg5: memref<128x16xbf16, #tpu.memory_space<vmem>>, %arg6: memref<8x16xf32, #tpu.memory_space<vmem>>, %arg7: memref<8x16xf32, #tpu.memory_space<vmem>>) attributes {dimension_semantics = [], scalar_prefetch = 0 : i64, scratch_operands = 0 : i64, tpu.core_type = #tpu.core_type<tc>} {
    %c0 = arith.constant 0 : index
    %c0_0 = arith.constant 0 : index
    %0 = vector.load %arg0[%c0, %c0_0] : memref<8x32xf32, #tpu.memory_space<vmem>>, vector<8x32xf32>
    %1 = arith.truncf %0 : vector<8x32xf32> to vector<8x32xbf16>
    %c0_1 = arith.constant 0 : index
    %c0_2 = arith.constant 0 : index
    %2 = vector.load %arg1[%c0_1, %c0_2] : memref<32x128xbf16, #tpu.memory_space<vmem>>, vector<32x128xbf16>
    %c0_3 = arith.constant 0 : index
    %c0_4 = arith.constant 0 : index
    %3 = vector.load %arg2[%c0_3, %c0_4] : memref<8x128xf32, #tpu.memory_space<vmem>>, vector<8x128xf32>
    %cst = arith.constant dense<0.000000e+00> : vector<8x128xf32>
    %4 = tpu.matmul %1, %2, %cst {dimension_numbers = #tpu.dot_dimension_numbers<[1], [0], [0], [1], [0, 0, 1, 1], [], []>} : vector<8x32xbf16>, vector<32x128xbf16>, vector<8x128xf32> -> vector<8x128xf32>
    %5 = arith.addf %4, %3 : vector<8x128xf32>
    %cst_5 = arith.constant 0.000000e+00 : f32
    %6 = vector.broadcast %cst_5 : f32 to vector<8x128xf32>
    %7 = arith.maximumf %5, %6 : vector<8x128xf32>
    %8 = arith.truncf %7 : vector<8x128xf32> to vector<8x128xbf16>
    %c0_6 = arith.constant 0 : index
    %c0_7 = arith.constant 0 : index
    %9 = vector.load %arg3[%c0_6, %c0_7] : memref<128x128xbf16, #tpu.memory_space<vmem>>, vector<128x128xbf16>
    %c0_8 = arith.constant 0 : index
    %c0_9 = arith.constant 0 : index
    %10 = vector.load %arg4[%c0_8, %c0_9] : memref<8x128xf32, #tpu.memory_space<vmem>>, vector<8x128xf32>
    %cst_10 = arith.constant dense<0.000000e+00> : vector<8x128xf32>
    %11 = tpu.matmul %8, %9, %cst_10 {dimension_numbers = #tpu.dot_dimension_numbers<[1], [0], [0], [1], [0, 0, 1, 1], [], []>} : vector<8x128xbf16>, vector<128x128xbf16>, vector<8x128xf32> -> vector<8x128xf32>
    %12 = arith.addf %11, %10 : vector<8x128xf32>
    %cst_11 = arith.constant 0.000000e+00 : f32
    %13 = vector.broadcast %cst_11 : f32 to vector<8x128xf32>
    %14 = arith.maximumf %12, %13 : vector<8x128xf32>
    %15 = arith.truncf %14 : vector<8x128xf32> to vector<8x128xbf16>
    %c0_12 = arith.constant 0 : index
    %c0_13 = arith.constant 0 : index
    %16 = vector.load %arg5[%c0_12, %c0_13] : memref<128x16xbf16, #tpu.memory_space<vmem>>, vector<128x16xbf16>
    %c0_14 = arith.constant 0 : index
    %c0_15 = arith.constant 0 : index
    %17 = vector.load %arg6[%c0_14, %c0_15] : memref<8x16xf32, #tpu.memory_space<vmem>>, vector<8x16xf32>
    %cst_16 = arith.constant dense<0.000000e+00> : vector<8x16xf32>
    %18 = tpu.matmul %15, %16, %cst_16 {dimension_numbers = #tpu.dot_dimension_numbers<[1], [0], [0], [1], [0, 0, 1, 1], [], []>} : vector<8x128xbf16>, vector<128x16xbf16>, vector<8x16xf32> -> vector<8x16xf32>
    %19 = arith.addf %18, %17 : vector<8x16xf32>
    %c0_17 = arith.constant 0 : index
    %c0_18 = arith.constant 0 : index
    %20 = vector.load %arg7[%c0_17, %c0_18] : memref<8x16xf32, #tpu.memory_space<vmem>>, vector<8x16xf32>
    tpu.vector_store %arg7[%c0_17, %c0_18], %19 {strides = array<i32>} : memref<8x16xf32, #tpu.memory_space<vmem>>, vector<8x16xf32>,
    return
  }
}

</mosaic_0001>

<bundles_post_ra>
// kernel: tpu_custom_call.1
= control target key start
LH: loop header
LB: loop body
LE: loop exit
PB: predicated region body
PF: predicated region fallthrough
CT: control target
= control target key end

     0   :  { %12 = vsyncpa [#allocation3], 0  ;;  %s641_s0 = inlined_call_operand.vmem [shape: f32[8,32], index: 0, kind: input, shape index: {}]   ;;  %s642_s1 = inlined_call_operand.hbm [shape: bf16[32,128], index: 1, kind: input, shape index: {}]   ;;  %s643_s2 = inlined_call_operand.hbm [shape: f32[8,128], index: 2, kind: input, shape index: {}]   ;;  %s644_s3 = inlined_call_operand.vmem [shape: bf16[128,128], index: 3, kind: input, shape index: {}]   ;;  %s645_s4 = inlined_call_operand.hbm [shape: f32[8,128], index: 4, kind: input, shape index: {}]   ;;  %s646_s5 = inlined_call_operand.vmem [shape: bf16[128,16], index: 5, kind: input, shape index: {}]   ;;  %s647_s6 = inlined_call_operand.hbm [shape: f32[8,16], index: 6, kind: input, shape index: {}]   ;;  %s648_s7 = inlined_call_operand.hbm [shape: f32[8,16], index: 7, kind: output, shape index: {}]  }
   0x1   :  { %13 = vsyncpa [#allocation6], 0 }
   0x2   :  { %14 = vsyncpa [#allocation9], 0  ;;  %s36_s26 = sshll.u32 %s643_s2, 4  ;;  %s37_s26 = int_to_ptr.hbm [resolvable:$true] %s36_s26 }
   0x3   :  { %15 = vsyncpa [#allocation4], 0  ;;  %s528_s27 = smov [#allocation5]   ;;  %s22_s8 = sshll.u32 %s642_s1, 4  ;;  %s23_s8 = int_to_ptr.hbm [resolvable:$true] %s22_s8 }
   0x4   :  { %s38_s28 = sshll.u32 %s528_s27, 4  ;;  %s529_s9 = smov [#allocation2]   ;;  %s39_s28 = int_to_ptr.vmem [resolvable:$true] %s38_s28 }
   0x5   :  { %41 = dma.hbm_to_vmem [thread:$0]  %s37_s26, 128, %s39_s28, [#allocation6]  }
   0x6   :  { %s24_s10 = sshll.u32 %s529_s9, 4  ;;  %s530_s11 = smov 64   ;;  %s25_s10 = int_to_ptr.vmem [resolvable:$true] %s24_s10 }
   0x7   :  { %s531_s12 = smov 4   ;;  %s49_s2 = sshll.u32 %s645_s4, 4  ;;  %s50_s2 = int_to_ptr.hbm [resolvable:$true] %s49_s2 }
   0x8   :  { %30 = dma.hbm_to_vmem [thread:$0]  %s23_s8, 256, %s25_s10, [#allocation3], %s530_s11, %s530_s11, %s531_s12  }
   0x9   :  { %s532_s15 = smov [#allocation7]   ;;  %s62_s1 = sshll.u32 %s647_s6, 4  ;;  %s63_s1 = int_to_ptr.hbm [resolvable:$true] %s62_s1 }
   0xa   :  { %s51_s16 = sshll.u32 %s532_s15, 4  ;;  %s533_s19 = smov [#allocation8]   ;;  %s52_s16 = int_to_ptr.vmem [resolvable:$true] %s51_s16 }
   0xb   :  { %54 = dma.hbm_to_vmem [thread:$0]  %s50_s2, 128, %s52_s16, [#allocation6]  }
   0xc   :  { %s64_s20 = sshll.u32 %s533_s19, 4  ;;  %s65_s20 = int_to_ptr.vmem [resolvable:$true] %s64_s20 }
   0xd   :  { %67 = dma.hbm_to_vmem [thread:$0]  %s63_s1, 128, %s65_s20, [#allocation9]  }
   0xe   :  { %520 = dma.done.wait [#allocation3], 256  }
   0xf   :  { %521 = vsyncadd [#allocation3], 4294967040 }
  0x10   :  { %522 = dma.done.wait [#allocation6], 256  }
  0x11   :  { %523 = vsyncadd [#allocation6], 4294967040 }
  0x12   :  { %524 = dma.done.wait [#allocation9], 128  }
  0x13   :  { %525 = vsyncadd [#allocation9], 4294967168  ;;  %v376_v0 = vld [vmem:[#allocation2 + $0x8] sm:$0xff]  ;;  %v384_v1 = vld [vmem:[%s644_s3 + $0x38] sm:$0xff]  ;;  %vm104_vm0 = vcmask 261120   ;;  %s534_s24 = smov [#allocation10]  }
  0x14   :  { %114 = vmatpush.bf16.msra.mxu0 %v376_v0  ;;  %v375_v2 = vld [vmem:[#allocation2] sm:$0xff]  ;;  %188 = vmatpush.bf16.msra.mxu1 %v384_v1  ;;  %v383_v4 = vld [vmem:[%s644_s3 + $0x30] sm:$0xff]  ;;  %v382_v6 = vld [vmem:[%s644_s3 + $0x28] sm:$0xff]  ;;  %s288_s25 = sshll.u32 %s534_s24, 4  ;;  %s290_s28 = sshll.u32 %s648_s7, 4  ;;  %vm281_vm1 = vcmask 130048   ;;  %s289_s25 = int_to_ptr.vmem [resolvable:$true] %s288_s25  ;;  %s291_s28 = int_to_ptr.hbm [resolvable:$true] %s290_s28 }
  0x15   :  { %v85_v3 = vld [vmem:[%s641_s0] sm:$0xff]  ;;  %v380_v8 = vld [vmem:[%s644_s3 + $0x18] sm:$0xff]  ;;  %v379_v9 = vld [vmem:[%s644_s3 + $0x10] sm:$0xff] }
  0x16   :  { %v86_v5 = vpack.c.bf16 %v85_v3, %v85_v3  ;;  %v381_v7 = vld [vmem:[%s644_s3 + $0x20] sm:$0xff]  ;;  %v378_v10 = vld [vmem:[%s644_s3 + $0x8] sm:$0xff]  ;;  %v392_v12 = vld [vmem:[%s646_s5 + $0x38] sm:$0xff] }
  0x17   :  { %v377_v11 = vld [vmem:[%s644_s3] sm:$0xff]  ;;  %268 = vmatpush.bf16.msra.mxu2 %v392_v12  ;;  %v391_v13 = vld [vmem:[%s646_s5 + $0x30] sm:$0xff]  ;;  %v390_v14 = vld [vmem:[%s646_s5 + $0x28] sm:$0xff] }
  0x18   :  { %115 = vmatpush.bf16.msra.mxu0 %v375_v2  ;;  %189 = vmatpush.bf16.msra.mxu1 %v383_v4  ;;  %v389_v15 = vld [vmem:[%s646_s5 + $0x20] sm:$0xff]  ;;  %v388_v16 = vld [vmem:[%s646_s5 + $0x18] sm:$0xff]  ;;  %v387_v17 = vld [vmem:[%s646_s5 + $0x10] sm:$0xff] }
  0x19   :  { %v91_v18 = vld [vmem:[#allocation5] sm:$0xff]  ;;  %v386_v24 = vld [vmem:[%s646_s5 + $0x8] sm:$0xff]  ;;  %v385_v25 = vld [vmem:[%s646_s5] sm:$0xff] }
  0x1a   :  { %v139_v26 = vld [vmem:[#allocation7] sm:$0xff]  ;;  %v219_v32 = vld [vmem:[#allocation8] sm:$0xff] }
  0x1b   :  { %310 = vmatmul.msk.bf16.vlgmr.msra.gmra.mxu0 %vm104_vm0, %v86_v5  ;;  %269 = vmatpush.bf16.msra.mxu2 %v391_v13 }
  0x1c   :  { %190 = vmatpush.bf16.msra.mxu1 %v382_v6 }
  0x1f   :  { %270 = vmatpush.bf16.msra.mxu2 %v390_v14 }
  0x20   :  { %191 = vmatpush.bf16.msra.mxu1 %v381_v7 }
  0x23   :  { %271 = vmatpush.bf16.msra.mxu2 %v389_v15 }
  0x24   :  { %192 = vmatpush.bf16.msra.mxu1 %v380_v8 }
  0x27   :  { %272 = vmatpush.bf16.msra.mxu2 %v388_v16 }
  0x28   :  { %193 = vmatpush.bf16.msra.mxu1 %v379_v9 }
  0x2b   :  { %273 = vmatpush.bf16.msra.mxu2 %v387_v17 }
  0x2c   :  { %194 = vmatpush.bf16.msra.mxu1 %v378_v10 }
  0x2f   :  { %274 = vmatpush.bf16.msra.mxu2 %v386_v24 }
  0x30   :  { %195 = vmatpush.bf16.msra.mxu1 %v377_v11 }
  0x33   :  { %275 = vmatpush.bf16.msra.mxu2 %v385_v25 }
  0x98   :  { %v117_v19 = vpop.f32.mrf.mxu0 }
  0x99   :  { %v118_v20 = vadd.f32 %v117_v19, %v91_v18 }
  0x9b   :  { %v121_v21 = vmax.f32 %v118_v20, 0.0 }
  0x9d   :  { %v122_v22 = vpack.c.bf16 %v121_v21, %v121_v21 }
  0x9f   :  { %196 = vmatmul.bf16.vlgmr.msra.gmra.mxu1 %v122_v22 }
  0xa0   :  { %v119_v23 = vpop.f32.mrf.mxu0 }
 0x11c   :  { %v197_v27 = vpop.f32.mrf.mxu1 }
 0x11d   :  { %v198_v28 = vadd.f32 %v197_v27, %v139_v26 }
 0x11f   :  { %v201_v29 = vmax.f32 %v198_v28, 0.0 }
 0x121   :  { %v202_v30 = vpack.c.bf16 %v201_v29, %v201_v29 }
 0x123   :  { %276 = vmatmul.bf16.vlgmr.msra.gmra.mxu2 %v202_v30 }
 0x124   :  { %v199_v31 = vpop.f32.mrf.mxu1 }
 0x1a6   :  { %v277_v33 = vpop.f32.mrf.mxu2 }
 0x1a7   :  { %v278_v34 = vadd.f32 %v277_v33, %v219_v32 }
 0x1a9   :  { %282 = vst.msk [vmem:[#allocation10] sm:$0xff] %vm281_vm1, %v278_v34 }
 0x1aa   :  { %293 = dma.vmem_to_hbm [thread:$0]  %s289_s25, 128, %s291_s28, [#allocation4]  }
 0x1ae   :  { %v279_v35 = vpop.f32.mrf.mxu2 }
 0x1af   :  { %526 = dma.done.wait [#allocation4], 128  }
 0x1b0   :  { %527 = vsyncadd [#allocation4], 4294967168 }
 0x1b1   :  { %298 = vsyncpa [#allocation3], 1 }
 0x1b2   :  { %299 = vsyncpa [#allocation6], 1 }
 0x1b3   :  { %300 = vsyncpa [#allocation9], 1 }
 0x1b4   :  { %301 = vsyncpa [#allocation4], 1 }

</bundles_post_ra>
